<compile_context>
chip_gen: v5e
topology: v5e:2x2
jax: 0.10.0
libtpu: 0.0.40
codegen_flags: <defaults>
</compile_context>

<pallas_src>
import math

import jax
import jax.numpy as jnp
from jax.experimental import pallas as pl
from jax.experimental.pallas import tpu as pltpu


def _decoder_kernel(z_ref, w1_ref, b1_ref, w2_ref, b2_ref, w3_ref, b3_ref,
                    out_ref):
    bf16 = jnp.bfloat16
    # fc1 + relu: bf16 MXU operands, f32 accumulate, f32 elementwise.
    h = jnp.dot(z_ref[...].astype(bf16), w1_ref[...],
                preferred_element_type=jnp.float32) + b1_ref[...]
    h = jnp.maximum(h, 0.0)
    # fc2 + relu
    h = jnp.dot(h.astype(bf16), w2_ref[...],
                preferred_element_type=jnp.float32) + b2_ref[...]
    h = jnp.maximum(h, 0.0)
    # fc3 + sigmoid
    h = jnp.dot(h.astype(bf16), w3_ref[...],
                preferred_element_type=jnp.float32) + b3_ref[...]
    out_ref[...] = jax.nn.sigmoid(h).astype(out_ref.dtype)


def _round_up(x, m):
    return ((x + m - 1) // m) * m


def prepare_params(params, *, lane_multiple=128):
    """One-time layout/dtype prep; call once and reuse for every forward.

    Weights -> bf16 (MXU operands), biases -> f32.  Only the fc3 output dim is
    zero-padded to a lane multiple (exact: pad cols produce sigmoid(0)=0.5 and
    are sliced off).  For large, MXU-bound models on v6e/v7x use
    lane_multiple=256 to fill the 256x256 MXU; keep 128 on v5e.
    """
    w1, b1, w2, b2, w3, b3 = params
    X = w3.shape[1]
    Xp = _round_up(X, lane_multiple)
    if Xp != X:
        w3 = jnp.zeros((w3.shape[0], Xp), w3.dtype).at[:, :X].set(w3)
        b3 = jnp.zeros((1, Xp), b3.dtype).at[:, :X].set(b3)
    bf16, f32 = jnp.bfloat16, jnp.float32
    return (w1.astype(bf16), b1.astype(f32),
            w2.astype(bf16), b2.astype(f32),
            w3.astype(bf16), b3.astype(f32))


def _choose_tile_b(B, tile_b):
    if B <= 8:
        return B  # single block equal to the full batch dim (legal block shape)
    # Multiple of 8 rows, capped at tile_b, and chosen so the grid has >= 2
    # steps, letting ("parallel",) shard the batch over v7x's two TensorCores.
    return max(8, min(tile_b, _round_up(pl.cdiv(B, 2), 8)))


def bernoulli_decoder_forward(z, prepared_params, *, out_dim=None, tile_b=1024):
    """z: (B, z_dim) f32 (or bf16) -> mu: (B, out_dim) float32."""
    w1, b1, w2, b2, w3, b3 = prepared_params
    B, Z = z.shape
    H = w1.shape[1]
    Xp = w3.shape[1]
    out_dim = Xp if out_dim is None else out_dim

    TB = _choose_tile_b(B, tile_b)
    grid = (pl.cdiv(B, TB),)

    z_bytes = B * Z * jnp.dtype(z.dtype).itemsize
    cost = pl.CostEstimate(
        flops=2 * B * (Z * H + H * H + H * Xp),
        transcendentals=B * Xp,                      # sigmoid
        bytes_accessed=(z_bytes + B * Xp * 4
                        + 2 * (Z * H + H * H + H * Xp)   # bf16 weights
                        + 4 * (2 * H + Xp)),             # f32 biases
    )

    def resident(shape):
        # Constant block index: DMA'd once, VMEM-resident across batch tiles.
        return pl.BlockSpec(shape, lambda i: (0, 0))

    out = pl.pallas_call(
        _decoder_kernel,
        out_shape=jax.ShapeDtypeStruct((B, Xp), jnp.float32),
        grid=grid,
        in_specs=[
            pl.BlockSpec((TB, Z), lambda i: (i, 0)),   # streamed z tile
            resident((Z, H)), resident((1, H)),
            resident((H, H)), resident((1, H)),
            resident((H, Xp)), resident((1, Xp)),
        ],
        out_specs=pl.BlockSpec((TB, Xp), lambda i: (i, 0)),
        compiler_params=pltpu.CompilerParams(
            dimension_semantics=("parallel",)),
        cost_estimate=cost,
    )(z, w1, b1, w2, b2, w3, b3)

    if out_dim != Xp:
        out = out[:, :out_dim]
    return out


def init_params(key, input_dim, z_dim, hidden_dim):
    """Deterministic init mimicking PyTorch nn.Linear defaults:
    W, b ~ U(-1/sqrt(fan_in), 1/sqrt(fan_in)). Weights stored as (in, out)."""
    def linear(k, fan_in, fan_out):
        kw, kb = jax.random.split(k)
        bound = 1.0 / math.sqrt(fan_in)
        w = jax.random.uniform(kw, (fan_in, fan_out), jnp.float32,
                               minval=-bound, maxval=bound)
        b = jax.random.uniform(kb, (1, fan_out), jnp.float32,
                               minval=-bound, maxval=bound)
        return w, b

    k1, k2, k3 = jax.random.split(key, 3)
    w1, b1 = linear(k1, z_dim, hidden_dim)
    w2, b2 = linear(k2, hidden_dim, hidden_dim)
    w3, b3 = linear(k3, hidden_dim, input_dim)
    return (w1, b1, w2, b2, w3, b3)


def _reference_forward(z, params):
    w1, b1, w2, b2, w3, b3 = params
    h = jax.nn.relu(z @ w1 + b1)
    h = jax.nn.relu(h @ w2 + b2)
    return jax.nn.sigmoid(h @ w3 + b3)


if __name__ == "__main__":
    # Small shapes consistent with the module: batch=2, z_dim=8,
    # hidden_dim=32, input_dim=64.
    B, Z, H, X = 2, 8, 32, 64

    key = jax.random.PRNGKey(0)
    kz, kp = jax.random.split(key)
    z = jax.random.normal(kz, (B, Z), dtype=jnp.float32)
    params = init_params(kp, input_dim=X, z_dim=Z, hidden_dim=H)
    prepared = prepare_params(params)   # one-time prep, reused across calls

    mu = bernoulli_decoder_forward(z, prepared, out_dim=X)
    mu = jax.block_until_ready(mu)

    ref = _reference_forward(z, params)   # f32 reference
    assert mu.shape == (B, X)
    # bf16 matmul operands -> loosened tolerance vs the f32 reference.
    assert jnp.allclose(mu, ref, atol=2e-2, rtol=2e-2)

    # Multi-tile grid + ragged final batch block (300 not divisible by 128).
    B2 = 300
    z2 = jax.random.normal(jax.random.PRNGKey(1), (B2, Z), dtype=jnp.float32)
    mu2 = jax.block_until_ready(
        bernoulli_decoder_forward(z2, prepared, out_dim=X, tile_b=128))
    ref2 = _reference_forward(z2, params)
    assert mu2.shape == (B2, X)
    assert jnp.allclose(mu2, ref2, atol=2e-2, rtol=2e-2)

    print("KERNEL_OK")
</pallas_src>

<mosaic_0001>
module attributes {stable_mosaic.version = 11 : i64} {
  func.func @_decoder_kernel(%arg0: i32, %arg1: memref<2x8xf32, #tpu.memory_space<vmem>>, %arg2: memref<8x32xbf16, #tpu.memory_space<vmem>>, %arg3: memref<1x32xf32, #tpu.memory_space<vmem>>, %arg4: memref<32x32xbf16, #tpu.memory_space<vmem>>, %arg5: memref<1x32xf32, #tpu.memory_space<vmem>>, %arg6: memref<32x128xbf16, #tpu.memory_space<vmem>>, %arg7: memref<1x128xf32, #tpu.memory_space<vmem>>, %arg8: memref<2x128xf32, #tpu.memory_space<vmem>>) attributes {dimension_semantics = [#tpu.dimension_semantics<parallel>], iteration_bounds = array<i64: 1>, scalar_prefetch = 0 : i64, scratch_operands = 0 : i64, tpu.core_type = #tpu.core_type<tc>, window_params = [{transform_indices = @transform_0, window_bounds = array<i64: 2, 8>}, {pipeline_mode = #tpu.pipeline_mode<synchronous>, transform_indices = @transform_1, window_bounds = array<i64: 8, 32>}, {pipeline_mode = #tpu.pipeline_mode<synchronous>, transform_indices = @transform_2, window_bounds = array<i64: 1, 32>}, {pipeline_mode = #tpu.pipeline_mode<synchronous>, transform_indices = @transform_3, window_bounds = array<i64: 32, 32>}, {pipeline_mode = #tpu.pipeline_mode<synchronous>, transform_indices = @transform_4, window_bounds = array<i64: 1, 32>}, {pipeline_mode = #tpu.pipeline_mode<synchronous>, transform_indices = @transform_5, window_bounds = array<i64: 32, 128>}, {pipeline_mode = #tpu.pipeline_mode<synchronous>, transform_indices = @transform_6, window_bounds = array<i64: 1, 128>}, {transform_indices = @transform_7, window_bounds = array<i64: 2, 128>}]} {
    %c0 = arith.constant 0 : index
    %c0_0 = arith.constant 0 : index
    %0 = vector.load %arg1[%c0, %c0_0] : memref<2x8xf32, #tpu.memory_space<vmem>>, vector<2x8xf32>
    %1 = arith.truncf %0 : vector<2x8xf32> to vector<2x8xbf16>
    %c0_1 = arith.constant 0 : index
    %c0_2 = arith.constant 0 : index
    %2 = vector.load %arg2[%c0_1, %c0_2] : memref<8x32xbf16, #tpu.memory_space<vmem>>, vector<8x32xbf16>
    %cst = arith.constant dense<0.000000e+00> : vector<2x32xf32>
    %3 = tpu.matmul %1, %2, %cst {dimension_numbers = #tpu.dot_dimension_numbers<[1], [0], [0], [1], [0, 0, 1, 1], [], []>} : vector<2x8xbf16>, vector<8x32xbf16>, vector<2x32xf32> -> vector<2x32xf32>
    %c0_3 = arith.constant 0 : index
    %c0_4 = arith.constant 0 : index
    %4 = vector.load %arg3[%c0_3, %c0_4] : memref<1x32xf32, #tpu.memory_space<vmem>>, vector<1x32xf32>
    %5 = vector.broadcast %4 : vector<1x32xf32> to vector<2x32xf32>
    %6 = arith.addf %3, %5 : vector<2x32xf32>
    %cst_5 = arith.constant 0.000000e+00 : f32
    %7 = vector.broadcast %cst_5 : f32 to vector<2x32xf32>
    %8 = arith.maximumf %6, %7 : vector<2x32xf32>
    %9 = arith.truncf %8 : vector<2x32xf32> to vector<2x32xbf16>
    %c0_6 = arith.constant 0 : index
    %c0_7 = arith.constant 0 : index
    %10 = vector.load %arg4[%c0_6, %c0_7] : memref<32x32xbf16, #tpu.memory_space<vmem>>, vector<32x32xbf16>
    %cst_8 = arith.constant dense<0.000000e+00> : vector<2x32xf32>
    %11 = tpu.matmul %9, %10, %cst_8 {dimension_numbers = #tpu.dot_dimension_numbers<[1], [0], [0], [1], [0, 0, 1, 1], [], []>} : vector<2x32xbf16>, vector<32x32xbf16>, vector<2x32xf32> -> vector<2x32xf32>
    %c0_9 = arith.constant 0 : index
    %c0_10 = arith.constant 0 : index
    %12 = vector.load %arg5[%c0_9, %c0_10] : memref<1x32xf32, #tpu.memory_space<vmem>>, vector<1x32xf32>
    %13 = vector.broadcast %12 : vector<1x32xf32> to vector<2x32xf32>
    %14 = arith.addf %11, %13 : vector<2x32xf32>
    %cst_11 = arith.constant 0.000000e+00 : f32
    %15 = vector.broadcast %cst_11 : f32 to vector<2x32xf32>
    %16 = arith.maximumf %14, %15 : vector<2x32xf32>
    %17 = arith.truncf %16 : vector<2x32xf32> to vector<2x32xbf16>
    %c0_12 = arith.constant 0 : index
    %c0_13 = arith.constant 0 : index
    %18 = vector.load %arg6[%c0_12, %c0_13] : memref<32x128xbf16, #tpu.memory_space<vmem>>, vector<32x128xbf16>
    %cst_14 = arith.constant dense<0.000000e+00> : vector<2x128xf32>
    %19 = tpu.matmul %17, %18, %cst_14 {dimension_numbers = #tpu.dot_dimension_numbers<[1], [0], [0], [1], [0, 0, 1, 1], [], []>} : vector<2x32xbf16>, vector<32x128xbf16>, vector<2x128xf32> -> vector<2x128xf32>
    %c0_15 = arith.constant 0 : index
    %c0_16 = arith.constant 0 : index
    %20 = vector.load %arg7[%c0_15, %c0_16] : memref<1x128xf32, #tpu.memory_space<vmem>>, vector<1x128xf32>
    %21 = vector.broadcast %20 : vector<1x128xf32> to vector<2x128xf32>
    %22 = arith.addf %19, %21 : vector<2x128xf32>
    %23 = arith.negf %22 : vector<2x128xf32>
    %24 = math.exp %23 : vector<2x128xf32>
    %cst_17 = arith.constant 1.000000e+00 : f32
    %25 = vector.broadcast %cst_17 : f32 to vector<2x128xf32>
    %26 = arith.addf %25, %24 : vector<2x128xf32>
    %27 = arith.divf %25, %26 : vector<2x128xf32>
    %c0_18 = arith.constant 0 : index
    %c0_19 = arith.constant 0 : index
    %28 = vector.load %arg8[%c0_18, %c0_19] : memref<2x128xf32, #tpu.memory_space<vmem>>, vector<2x128xf32>
    tpu.vector_store %arg8[%c0_18, %c0_19], %27 {strides = array<i32>} : memref<2x128xf32, #tpu.memory_space<vmem>>, vector<2x128xf32>,
    return
  }
  func.func @transform_0(%arg0: i32) -> (i32, i32) {
    %c0_i32 = arith.constant 0 : i32
    %c0_i32_0 = arith.constant 0 : i32
    return %arg0, %c0_i32 : i32, i32
  }
  func.func @transform_1(%arg0: i32) -> (i32, i32) {
    %c0_i32 = arith.constant 0 : i32
    %c0_i32_0 = arith.constant 0 : i32
    %c0_i32_1 = arith.constant 0 : i32
    return %c0_i32, %c0_i32_0 : i32, i32
  }
  func.func @transform_2(%arg0: i32) -> (i32, i32) {
    %c0_i32 = arith.constant 0 : i32
    %c0_i32_0 = arith.constant 0 : i32
    %c0_i32_1 = arith.constant 0 : i32
    return %c0_i32, %c0_i32_0 : i32, i32
  }
  func.func @transform_3(%arg0: i32) -> (i32, i32) {
    %c0_i32 = arith.constant 0 : i32
    %c0_i32_0 = arith.constant 0 : i32
    %c0_i32_1 = arith.constant 0 : i32
    return %c0_i32, %c0_i32_0 : i32, i32
  }
  func.func @transform_4(%arg0: i32) -> (i32, i32) {
    %c0_i32 = arith.constant 0 : i32
    %c0_i32_0 = arith.constant 0 : i32
    %c0_i32_1 = arith.constant 0 : i32
    return %c0_i32, %c0_i32_0 : i32, i32
  }
  func.func @transform_5(%arg0: i32) -> (i32, i32) {
    %c0_i32 = arith.constant 0 : i32
    %c0_i32_0 = arith.constant 0 : i32
    %c0_i32_1 = arith.constant 0 : i32
    return %c0_i32, %c0_i32_0 : i32, i32
  }
  func.func @transform_6(%arg0: i32) -> (i32, i32) {
    %c0_i32 = arith.constant 0 : i32
    %c0_i32_0 = arith.constant 0 : i32
    %c0_i32_1 = arith.constant 0 : i32
    return %c0_i32, %c0_i32_0 : i32, i32
  }
  func.func @transform_7(%arg0: i32) -> (i32, i32) {
    %c0_i32 = arith.constant 0 : i32
    %c0_i32_0 = arith.constant 0 : i32
    return %arg0, %c0_i32 : i32, i32
  }
}

</mosaic_0001>

<bundles_post_ra>
// kernel: tpu_custom_call.1
= control target key start
LH: loop header
LB: loop body
LE: loop exit
PB: predicated region body
PF: predicated region fallthrough
CT: control target
= control target key end

     0   :  { %12 = vsyncpa [#allocation3], 0  ;;  %s468_s0 = inlined_call_operand.hbm [shape: f32[2,8], index: 0, kind: input, shape index: {}]   ;;  %s469_s1 = inlined_call_operand.hbm [shape: bf16[8,32], index: 1, kind: input, shape index: {}]   ;;  %s470_s2 = inlined_call_operand.vmem [shape: f32[1,32], index: 2, kind: input, shape index: {}]   ;;  %s471_s3 = inlined_call_operand.hbm [shape: bf16[32,32], index: 3, kind: input, shape index: {}]   ;;  %s472_s4 = inlined_call_operand.vmem [shape: f32[1,32], index: 4, kind: input, shape index: {}]   ;;  %s473_s5 = inlined_call_operand.hbm [shape: bf16[32,128], index: 5, kind: input, shape index: {}]   ;;  %s474_s6 = inlined_call_operand.vmem [shape: f32[1,128], index: 6, kind: input, shape index: {}]   ;;  %s475_s7 = inlined_call_operand.hbm [shape: f32[2,128], index: 7, kind: output, shape index: {}]  }
   0x1   :  { %13 = vsyncpa [#allocation6], 0 }
   0x2   :  { %14 = vsyncpa [#allocation9], 0  ;;  %s32_s26 = sshll.u32 %s469_s1, 4  ;;  %s33_s26 = int_to_ptr.hbm [resolvable:$true] %s32_s26 }
   0x3   :  { %15 = vsyncpa [#allocation4], 0  ;;  %s397_s27 = smov [#allocation5]   ;;  %s21_s8 = sshll.u32 %s468_s0, 4  ;;  %s22_s8 = int_to_ptr.hbm [resolvable:$true] %s21_s8 }
   0x4   :  { %s34_s28 = sshll.u32 %s397_s27, 4  ;;  %s398_s9 = smov [#allocation2]   ;;  %s35_s28 = int_to_ptr.vmem [resolvable:$true] %s34_s28 }
   0x5   :  { %37 = dma.hbm_to_vmem [thread:$0]  %s33_s26, 64, %s35_s28, [#allocation6]  }
   0x6   :  { %s23_s10 = sshll.u32 %s398_s9, 4  ;;  %s44_s13 = sshll.u32 %s471_s3, 4  ;;  %s24_s10 = int_to_ptr.vmem [resolvable:$true] %s23_s10  ;;  %s45_s13 = int_to_ptr.hbm [resolvable:$true] %s44_s13 }
   0x7   :  { %26 = dma.hbm_to_vmem [thread:$0]  %s22_s8, 32, %s24_s10, [#allocation3]  }
   0x8   :  { %s399_s1 = smov [#allocation7]   ;;  %s59_s17 = sshll.u32 %s473_s5, 4  ;;  %s60_s17 = int_to_ptr.hbm [resolvable:$true] %s59_s17 }
   0x9   :  { %s46_s14 = sshll.u32 %s399_s1, 4  ;;  %s400_s18 = smov 64   ;;  %s47_s14 = int_to_ptr.vmem [resolvable:$true] %s46_s14 }
   0xa   :  { %s401_s0 = smov 4   ;;  %s402_s19 = smov [#allocation8]  }
   0xb   :  { %52 = dma.hbm_to_vmem [thread:$0]  %s45_s13, 256, %s47_s14, [#allocation6], %s400_s18, %s400_s18, %s401_s0  }
   0xc   :  { %s61_s20 = sshll.u32 %s402_s19, 4  ;;  %s62_s20 = int_to_ptr.vmem [resolvable:$true] %s61_s20 }
   0xd   :  { %67 = dma.hbm_to_vmem [thread:$0]  %s60_s17, 256, %s62_s20, [#allocation9], %s400_s18, %s400_s18, %s401_s0  }
   0xe   :  { %389 = dma.done.wait [#allocation3], 32  }
   0xf   :  { %390 = vsyncadd [#allocation3], 4294967264 }
  0x10   :  { %391 = dma.done.wait [#allocation6], 320  }
  0x11   :  { %392 = vsyncadd [#allocation6], 4294966976 }
  0x12   :  { %393 = dma.done.wait [#allocation9], 256  }
  0x13   :  { %394 = vsyncadd [#allocation9], 4294967040  ;;  %vm98_vm0 = vcmask 1043456   ;;  %v89_v0 = vld [vmem:[#allocation5] sm:$0xf]  ;;  %vm94_vm1 = vcmask 64512  }
  0x14   :  { %v87_v1 = vld [vmem:[#allocation2] sm:$0x3]  ;;  %v100_v2 = vsel %vm98_vm0, %v89_v0, 0  ;;  %v252_v4 = vld [vmem:[#allocation7 + $0x8] sm:$0xff]  ;;  %v251_v5 = vld [vmem:[#allocation7] sm:$0xff]  ;;  %vm137_vm2 = vcmask 261120  }
  0x15   :  { %v88_v3 = vpack.c.bf16 %v87_v1, %v87_v1  ;;  %109 = vmatpush.bf16.msra.mxu0 %v100_v2  ;;  %147 = vmatpush.bf16.msra.mxu1 %v252_v4  ;;  %v262_v6 = vld [vmem:[%s470_s2] ss:$0 sm:$0xff]  ;;  %v253_v13 = vld [vmem:[#allocation8] sm:$0xff] }
  0x16   :  { %v254_v12 = vld [vmem:[#allocation8 + $0x8] sm:$0xff] }
  0x17   :  { %185 = vmatpush.bf16.msra.mxu2 %v254_v12  ;;  %v263_v14 = vld [vmem:[%s472_s4] ss:$0 sm:$0xff]  ;;  %s403_s4 = smov [#allocation10]  }
  0x18   :  { %231 = vmatmul.msk.bf16.vlgmr.msra.gmra.mxu0 %vm94_vm1, %v88_v3  ;;  %v264_v20 = vld [vmem:[%s474_s6] ss:$0 sm:$0xff]  ;;  %s217_s24 = sshll.u32 %s403_s4, 4  ;;  %s219_s6 = sshll.u32 %s475_s7, 4  ;;  %s218_s24 = int_to_ptr.vmem [resolvable:$true] %s217_s24  ;;  %s220_s6 = int_to_ptr.hbm [resolvable:$true] %s219_s6 }
  0x19   :  { %148 = vmatpush.bf16.msra.mxu1 %v251_v5 }
  0x1b   :  { %186 = vmatpush.bf16.msra.mxu2 %v253_v13 }
  0x95   :  { %v111_v7 = vpop.f32.mrf.mxu0 }
  0x96   :  { %v112_v8 = vadd.f32 %v262_v6, %v111_v7 }
  0x98   :  { %v115_v9 = vmax.f32 %v112_v8, 0.0 }
  0x9a   :  { %v116_v10 = vpack.c.bf16 %v115_v9, %v115_v9 }
  0x9c   :  { %240 = vmatmul.msk.bf16.vlgmr.msra.gmra.mxu1 %vm137_vm2, %v116_v10 }
  0x9d   :  { %v113_v11 = vpop.f32.mrf.mxu0 }
 0x119   :  { %v150_v15 = vpop.f32.mrf.mxu1 }
 0x11a   :  { %v151_v16 = vadd.f32 %v263_v14, %v150_v15 }
 0x11c   :  { %v154_v17 = vmax.f32 %v151_v16, 0.0 }
 0x11e   :  { %v155_v18 = vpack.c.bf16 %v154_v17, %v154_v17 }
 0x120   :  { %249 = vmatmul.msk.bf16.vlgmr.msra.gmra.mxu2 %vm137_vm2, %v155_v18 }
 0x121   :  { %v152_v19 = vpop.f32.mrf.mxu1 }
 0x1a3   :  { %v188_v21 = vpop.f32.mrf.mxu2 }
 0x1a4   :  { %v189_v22 = vadd.f32 %v264_v20, %v188_v21 }
 0x1a6   :  { %v250_v23 = vmul.f32 -1.442695, %v189_v22 }
 0x1a8   :  { %265 = vpow2.f32 %v250_v23 }
 0x1ab   :  { %v190_v24 = vpop.f32.mrf.mxu2 }
 0x1ae   :  { %v266_v25 = vpop.eup %265 }
 0x1af   :  { %v195_v26 = vadd.f32 1.0, %v266_v25 }
 0x1b1   :  { %267 = vrcp.f32 %v195_v26  ;;  %v207_v30 = vand.u32 2147483648, %v195_v26  ;;  %v205_v32 = vand.u32 2147483647, %v195_v26  ;;  %vm201_vm4 = vweird.f32 %v195_v26 }
 0x1b3   :  { %v208_v34 = vor.u32 1.1754944e-38, %v207_v30  ;;  %vm206_vm6 = vcmp.eq.f32.partialorder %v205_v32, 8.507059e+37 }
 0x1b7   :  { %v268_v27 = vpop.eup %267 }
 0x1b8   :  { %v197_v28 = vmul.f32 %v268_v27, %v195_v26  ;;  %vm202_vm3 = vweird.f32 %v268_v27 }
 0x1b9   :  { %vm203_vm5 = vmor %vm201_vm4, %vm202_vm3 }
 0x1ba   :  { %v198_v29 = vsub.f32 1.0, %v197_v28 }
 0x1bc   :  { %v199_v31 = vmul.f32 %v268_v27, %v198_v29 }
 0x1be   :  { %v200_v33 = vadd.f32 %v268_v27, %v199_v31 }
 0x1c0   :  { %v204_v35 = vsel %vm203_vm5, %v268_v27, %v200_v33 }
 0x1c1   :  { %v209_v36 = vsel %vm206_vm6, %v208_v34, %v204_v35 }
 0x1c2   :  { %211 = vst [vmem:[#allocation10] sm:$0x3] %v209_v36 }
 0x1c3   :  { %222 = dma.vmem_to_hbm [thread:$0]  %s218_s24, 32, %s220_s6, [#allocation4]  }
 0x1c4   :  { %395 = dma.done.wait [#allocation4], 32  }
 0x1c5   :  { %396 = vsyncadd [#allocation4], 4294967264 }
 0x1c6   :  { %227 = vsyncpa [#allocation3], 1 }
 0x1c7   :  { %228 = vsyncpa [#allocation6], 1 }
 0x1c8   :  { %229 = vsyncpa [#allocation9], 1 }
 0x1c9   :  { %230 = vsyncpa [#allocation4], 1 }

</bundles_post_ra>
